<compile_context>
chip_gen: v7x
topology: tpu7x:2x2x1
jax: 0.10.0
libtpu: 0.0.40
codegen_flags: <defaults>
</compile_context>

<pallas_src>
import jax
import jax.numpy as jnp
from jax.experimental import pallas as pl
from jax.experimental.pallas import tpu as pltpu


def _round_up(x, m):
    return (x + m - 1) // m * m


def qnetwork_kernel(x_ref, w1_ref, b1_ref, w2_ref, b2_ref, w3_ref, b3_ref, o_ref):
    bf = jnp.bfloat16

    # Cast x to bf16 in-kernel (free on VPU; avoids an extra wrapper-side HBM pass).
    x = x_ref[...].astype(bf)

    # Layer 1: Linear(state -> hidden) + ReLU  (bf16 MXU, f32 accumulate, f32 elementwise)
    h1 = jnp.dot(x, w1_ref[...].astype(bf), preferred_element_type=jnp.float32)
    h1 = jnp.maximum(h1 + b1_ref[...], 0.0)

    # Layer 2: Linear(hidden -> hidden) + ReLU
    h2 = jnp.dot(h1.astype(bf), w2_ref[...].astype(bf),
                 preferred_element_type=jnp.float32)
    h2 = jnp.maximum(h2 + b2_ref[...], 0.0)

    # Layer 3: Linear(hidden -> action), no activation. Narrow (action_size) store.
    out = jnp.dot(h2.astype(bf), w3_ref[...].astype(bf),
                  preferred_element_type=jnp.float32)
    o_ref[...] = (out + b3_ref[...]).astype(o_ref.dtype)


def qnetwork_forward(x, params, *, tile_batch=4096):
    """x: [batch, state_size] float32. params: dict of w1,b1,w2,b2,w3,b3 ([in,out] layout)."""
    w1, b1 = params["w1"], params["b1"]
    w2, b2 = params["w2"], params["b2"]
    w3, b3 = params["w3"], params["b3"]

    batch, state_size = x.shape
    hidden = w1.shape[1]
    action_size = w3.shape[1]

    # Batch tile: multiple of 16 (native bf16 sublane packing), at most ceil(batch/2)
    # rounded up so the grid has >= 2 steps whenever possible (v7x megacore split),
    # capped by tile_batch. Pallas masks the ragged last tile; no host-side padding.
    tb = min(_round_up(tile_batch, 16), _round_up(pl.cdiv(batch, 2), 16))
    tb = max(tb, 16)
    grid = (pl.cdiv(batch, tb),)

    b1_f = b1.astype(jnp.float32).reshape(1, hidden)
    b2_f = b2.astype(jnp.float32).reshape(1, hidden)
    b3_f = b3.astype(jnp.float32).reshape(1, action_size)

    # Weights/biases: constant block index -> fetched once, VMEM-resident across steps.
    def resident(shape):
        return pl.BlockSpec(shape, lambda i: (0,) * len(shape))

    out = pl.pallas_call(
        qnetwork_kernel,
        out_shape=jax.ShapeDtypeStruct((batch, action_size), jnp.float32),
        grid=grid,
        in_specs=[
            pl.BlockSpec((tb, state_size), lambda i: (i, 0)),
            resident(w1.shape), resident(b1_f.shape),
            resident(w2.shape), resident(b2_f.shape),
            resident(w3.shape), resident(b3_f.shape),
        ],
        out_specs=pl.BlockSpec((tb, action_size), lambda i: (i, 0)),
        compiler_params=pltpu.CompilerParams(
            dimension_semantics=("parallel",)),
    )(x.astype(jnp.float32), w1.astype(jnp.float32), b1_f,
      w2.astype(jnp.float32), b2_f, w3.astype(jnp.float32), b3_f)

    return out


def init_params(key, state_size, action_size, hidden=64):
    """Deterministic init mimicking nn.Linear default (uniform(-1/sqrt(fan_in), ..))."""
    def linear_init(k, fan_in, fan_out):
        kw, kb = jax.random.split(k)
        bound = 1.0 / jnp.sqrt(jnp.float32(fan_in))
        w = jax.random.uniform(kw, (fan_in, fan_out), jnp.float32, -bound, bound)
        b = jax.random.uniform(kb, (1, fan_out), jnp.float32, -bound, bound)
        return w, b

    k1, k2, k3 = jax.random.split(key, 3)
    w1, b1 = linear_init(k1, state_size, hidden)
    w2, b2 = linear_init(k2, hidden, hidden)
    w3, b3 = linear_init(k3, hidden, action_size)
    return {"w1": w1, "b1": b1, "w2": w2, "b2": b2, "w3": w3, "b3": b3}


def qnetwork_reference_bf16(x, params):
    """Pure-JAX reference using the same bf16-into-MXU / f32-accumulate recipe."""
    bf = jnp.bfloat16
    h = jnp.dot(x.astype(bf), params["w1"].astype(bf),
                preferred_element_type=jnp.float32) + params["b1"]
    h = jnp.maximum(h, 0.0)
    h = jnp.dot(h.astype(bf), params["w2"].astype(bf),
                preferred_element_type=jnp.float32) + params["b2"]
    h = jnp.maximum(h, 0.0)
    return jnp.dot(h.astype(bf), params["w3"].astype(bf),
                   preferred_element_type=jnp.float32) + params["b3"]


def qnetwork_reference_f32(x, params):
    """Full-precision reference of the PyTorch forward pass."""
    h = jnp.maximum(x @ params["w1"] + params["b1"], 0.0)
    h = jnp.maximum(h @ params["w2"] + params["b2"], 0.0)
    return h @ params["w3"] + params["b3"]


if __name__ == "__main__":
    key = jax.random.PRNGKey(0)
    k_params, k_x = jax.random.split(key)

    batch, state_size, action_size, hidden = 8, 8, 4, 64
    params = init_params(k_params, state_size, action_size, hidden)
    x = jax.random.normal(k_x, (batch, state_size), jnp.float32)

    out = qnetwork_forward(x, params)
    out = jax.block_until_ready(out)
    assert out.shape == (batch, action_size)

    # Matches the bf16-weight / f32-accumulate recipe tightly...
    ref_bf = qnetwork_reference_bf16(x, params)
    assert jnp.allclose(out, ref_bf, atol=1e-3, rtol=1e-3)
    # ...and the full-f32 PyTorch semantics within bf16 error.
    ref_f32 = qnetwork_reference_f32(x, params)
    assert jnp.allclose(out, ref_f32, atol=5e-2, rtol=5e-2)

    # Larger, non-tile-aligned batch: exercises the 2-step grid + masked boundary tile.
    k_big = jax.random.PRNGKey(1)
    x_big = jax.random.normal(k_big, (1037, state_size), jnp.float32)
    out_big = jax.block_until_ready(qnetwork_forward(x_big, params, tile_batch=4096))
    ref_big = qnetwork_reference_bf16(x_big, params)
    assert out_big.shape == (1037, action_size)
    assert jnp.allclose(out_big, ref_big, atol=1e-3, rtol=1e-3)

    print("KERNEL_OK")
</pallas_src>

<mosaic_0001>
module attributes {stable_mosaic.version = 11 : i64} {
  func.func @qnetwork_kernel(%arg0: i32, %arg1: memref<16x8xf32, #tpu.memory_space<vmem>>, %arg2: memref<8x64xf32, #tpu.memory_space<vmem>>, %arg3: memref<1x64xf32, #tpu.memory_space<vmem>>, %arg4: memref<64x64xf32, #tpu.memory_space<vmem>>, %arg5: memref<1x64xf32, #tpu.memory_space<vmem>>, %arg6: memref<64x4xf32, #tpu.memory_space<vmem>>, %arg7: memref<1x4xf32, #tpu.memory_space<vmem>>, %arg8: memref<16x4xf32, #tpu.memory_space<vmem>>) attributes {dimension_semantics = [#tpu.dimension_semantics<parallel>], iteration_bounds = array<i64: 1>, scalar_prefetch = 0 : i64, scratch_operands = 0 : i64, tpu.core_type = #tpu.core_type<tc>, window_params = [{transform_indices = @transform_0, window_bounds = array<i64: 16, 8>}, {pipeline_mode = #tpu.pipeline_mode<synchronous>, transform_indices = @transform_1, window_bounds = array<i64: 8, 64>}, {pipeline_mode = #tpu.pipeline_mode<synchronous>, transform_indices = @transform_2, window_bounds = array<i64: 1, 64>}, {pipeline_mode = #tpu.pipeline_mode<synchronous>, transform_indices = @transform_3, window_bounds = array<i64: 64, 64>}, {pipeline_mode = #tpu.pipeline_mode<synchronous>, transform_indices = @transform_4, window_bounds = array<i64: 1, 64>}, {pipeline_mode = #tpu.pipeline_mode<synchronous>, transform_indices = @transform_5, window_bounds = array<i64: 64, 4>}, {pipeline_mode = #tpu.pipeline_mode<synchronous>, transform_indices = @transform_6, window_bounds = array<i64: 1, 4>}, {transform_indices = @transform_7, window_bounds = array<i64: 16, 4>}]} {
    %c0 = arith.constant 0 : index
    %c0_0 = arith.constant 0 : index
    %0 = vector.load %arg1[%c0, %c0_0] : memref<16x8xf32, #tpu.memory_space<vmem>>, vector<16x8xf32>
    %1 = arith.truncf %0 : vector<16x8xf32> to vector<16x8xbf16>
    %c0_1 = arith.constant 0 : index
    %c0_2 = arith.constant 0 : index
    %2 = vector.load %arg2[%c0_1, %c0_2] : memref<8x64xf32, #tpu.memory_space<vmem>>, vector<8x64xf32>
    %3 = arith.truncf %2 : vector<8x64xf32> to vector<8x64xbf16>
    %cst = arith.constant dense<0.000000e+00> : vector<16x64xf32>
    %4 = tpu.matmul %1, %3, %cst {dimension_numbers = #tpu.dot_dimension_numbers<[1], [0], [0], [1], [0, 0, 1, 1], [], []>} : vector<16x8xbf16>, vector<8x64xbf16>, vector<16x64xf32> -> vector<16x64xf32>
    %c0_3 = arith.constant 0 : index
    %c0_4 = arith.constant 0 : index
    %5 = vector.load %arg3[%c0_3, %c0_4] : memref<1x64xf32, #tpu.memory_space<vmem>>, vector<1x64xf32>
    %6 = vector.broadcast %5 : vector<1x64xf32> to vector<16x64xf32>
    %7 = arith.addf %4, %6 : vector<16x64xf32>
    %cst_5 = arith.constant 0.000000e+00 : f32
    %8 = vector.broadcast %cst_5 : f32 to vector<16x64xf32>
    %9 = arith.maximumf %7, %8 : vector<16x64xf32>
    %10 = arith.truncf %9 : vector<16x64xf32> to vector<16x64xbf16>
    %c0_6 = arith.constant 0 : index
    %c0_7 = arith.constant 0 : index
    %11 = vector.load %arg4[%c0_6, %c0_7] : memref<64x64xf32, #tpu.memory_space<vmem>>, vector<64x64xf32>
    %12 = arith.truncf %11 : vector<64x64xf32> to vector<64x64xbf16>
    %cst_8 = arith.constant dense<0.000000e+00> : vector<16x64xf32>
    %13 = tpu.matmul %10, %12, %cst_8 {dimension_numbers = #tpu.dot_dimension_numbers<[1], [0], [0], [1], [0, 0, 1, 1], [], []>} : vector<16x64xbf16>, vector<64x64xbf16>, vector<16x64xf32> -> vector<16x64xf32>
    %c0_9 = arith.constant 0 : index
    %c0_10 = arith.constant 0 : index
    %14 = vector.load %arg5[%c0_9, %c0_10] : memref<1x64xf32, #tpu.memory_space<vmem>>, vector<1x64xf32>
    %15 = vector.broadcast %14 : vector<1x64xf32> to vector<16x64xf32>
    %16 = arith.addf %13, %15 : vector<16x64xf32>
    %cst_11 = arith.constant 0.000000e+00 : f32
    %17 = vector.broadcast %cst_11 : f32 to vector<16x64xf32>
    %18 = arith.maximumf %16, %17 : vector<16x64xf32>
    %19 = arith.truncf %18 : vector<16x64xf32> to vector<16x64xbf16>
    %c0_12 = arith.constant 0 : index
    %c0_13 = arith.constant 0 : index
    %20 = vector.load %arg6[%c0_12, %c0_13] : memref<64x4xf32, #tpu.memory_space<vmem>>, vector<64x4xf32>
    %21 = arith.truncf %20 : vector<64x4xf32> to vector<64x4xbf16>
    %cst_14 = arith.constant dense<0.000000e+00> : vector<16x4xf32>
    %22 = tpu.matmul %19, %21, %cst_14 {dimension_numbers = #tpu.dot_dimension_numbers<[1], [0], [0], [1], [0, 0, 1, 1], [], []>} : vector<16x64xbf16>, vector<64x4xbf16>, vector<16x4xf32> -> vector<16x4xf32>
    %c0_15 = arith.constant 0 : index
    %c0_16 = arith.constant 0 : index
    %23 = vector.load %arg7[%c0_15, %c0_16] : memref<1x4xf32, #tpu.memory_space<vmem>>, vector<1x4xf32>
    %24 = vector.broadcast %23 : vector<1x4xf32> to vector<16x4xf32>
    %25 = arith.addf %22, %24 : vector<16x4xf32>
    %c0_17 = arith.constant 0 : index
    %c0_18 = arith.constant 0 : index
    %26 = vector.load %arg8[%c0_17, %c0_18] : memref<16x4xf32, #tpu.memory_space<vmem>>, vector<16x4xf32>
    tpu.vector_store %arg8[%c0_17, %c0_18], %25 {strides = array<i32>} : memref<16x4xf32, #tpu.memory_space<vmem>>, vector<16x4xf32>,
    return
  }
  func.func @transform_0(%arg0: i32) -> (i32, i32) {
    %c0_i32 = arith.constant 0 : i32
    %c0_i32_0 = arith.constant 0 : i32
    return %arg0, %c0_i32 : i32, i32
  }
  func.func @transform_1(%arg0: i32) -> (i32, i32) {
    %c0_i32 = arith.constant 0 : i32
    %c0_i32_0 = arith.constant 0 : i32
    %c0_i32_1 = arith.constant 0 : i32
    return %c0_i32, %c0_i32_0 : i32, i32
  }
  func.func @transform_2(%arg0: i32) -> (i32, i32) {
    %c0_i32 = arith.constant 0 : i32
    %c0_i32_0 = arith.constant 0 : i32
    %c0_i32_1 = arith.constant 0 : i32
    return %c0_i32, %c0_i32_0 : i32, i32
  }
  func.func @transform_3(%arg0: i32) -> (i32, i32) {
    %c0_i32 = arith.constant 0 : i32
    %c0_i32_0 = arith.constant 0 : i32
    %c0_i32_1 = arith.constant 0 : i32
    return %c0_i32, %c0_i32_0 : i32, i32
  }
  func.func @transform_4(%arg0: i32) -> (i32, i32) {
    %c0_i32 = arith.constant 0 : i32
    %c0_i32_0 = arith.constant 0 : i32
    %c0_i32_1 = arith.constant 0 : i32
    return %c0_i32, %c0_i32_0 : i32, i32
  }
  func.func @transform_5(%arg0: i32) -> (i32, i32) {
    %c0_i32 = arith.constant 0 : i32
    %c0_i32_0 = arith.constant 0 : i32
    %c0_i32_1 = arith.constant 0 : i32
    return %c0_i32, %c0_i32_0 : i32, i32
  }
  func.func @transform_6(%arg0: i32) -> (i32, i32) {
    %c0_i32 = arith.constant 0 : i32
    %c0_i32_0 = arith.constant 0 : i32
    %c0_i32_1 = arith.constant 0 : i32
    return %c0_i32, %c0_i32_0 : i32, i32
  }
  func.func @transform_7(%arg0: i32) -> (i32, i32) {
    %c0_i32 = arith.constant 0 : i32
    %c0_i32_0 = arith.constant 0 : i32
    return %arg0, %c0_i32 : i32, i32
  }
}

</mosaic_0001>

<bundles_post_ra>
// kernel: tpu_custom_call.1
= control target key start
LH: loop header
LB: loop body
LE: loop exit
PB: predicated region body
PF: predicated region fallthrough
CT: control target
= control target key end

     0   :  { %12 = vsyncpa [#allocation3], 0  ;;  %s352_s24 = smov [#allocation2]   ;;  %s478_s0 = inlined_call_operand.vmem [shape: f32[8,8], index: 0, kind: input, shape index: {}]   ;;  %s479_s1 = inlined_call_operand.hbm [shape: f32[8,64], index: 1, kind: input, shape index: {}]   ;;  %s480_s2 = inlined_call_operand.vmem [shape: f32[1,64], index: 2, kind: input, shape index: {}]   ;;  %s481_s3 = inlined_call_operand.vmem [shape: f32[64,64], index: 3, kind: input, shape index: {}]   ;;  %s482_s4 = inlined_call_operand.vmem [shape: f32[1,64], index: 4, kind: input, shape index: {}]   ;;  %s483_s5 = inlined_call_operand.vmem [shape: f32[64,4], index: 5, kind: input, shape index: {}]   ;;  %s484_s6 = inlined_call_operand.vmem [shape: f32[1,4], index: 6, kind: input, shape index: {}]   ;;  %s485_s7 = inlined_call_operand.vmem [shape: f32[8,4], index: 7, kind: output, shape index: {}]  }
   0x1   :  { %s21_s25 = sshll.u32 %s352_s24, 4  ;;  %s328_s28 = scalar_lea.hbm %s479_s1, 128  ;;  %s22_s25 = int_to_ptr.vmem [resolvable:$true] %s21_s25 }
   0x2   :  { %p329_p0 = scmp.ne.s32.totalorder %s479_s1, %s328_s28  ;;  %p332_p1 = scmp.lt.u32.totalorder %s328_s28, %s479_s1 }
   0x4   :  { %p334_p2 = pnand %p332_p1, %p329_p0 }
   0x6   :  { %337 = shalt.err (!%p334_p2)
}
   0x7   :  { %s338_s10 = scalar_lea.vmem %s22_s25, 128  ;;  %p343_p4 = scmp.lt.s32.totalorder %s22_s25, %s22_s25 }
   0x8   :  { %p339_p3 = scmp.ne.s32.totalorder %s22_s25, %s338_s10  ;;  %p344_p5 = scmp.lt.s32.totalorder %s338_s10, %s338_s10 }
   0xa   :  { %p345_p6 = por %p344_p5, %p343_p4 }
   0xc   :  { %p346_p7 = pnand %p345_p6, %p339_p3 }
   0xe   :  { %349 = shalt.err (!%p346_p7)
}
   0xf   :  { %24 = dma.hbm_to_vmem [thread:$0]  %s479_s1, 128, %s22_s25, [#allocation3]  }
  0x10   :  { %350 = dma.done.wait [#allocation3], 128  }
  0x11   :  { %351 = vsyncadd [#allocation3], 4294967168  ;;  %v353_v0 = vmov 0.0   ;;  %vm354_vm0 = vmmov 0   ;;  %v42_v1 = vld [vmem:[#allocation2] sm:$0xff]  ;;  %vm55_vm1 = vcmask 1043456  }
  0x12   :  { %295 = vmatprep.subr.bf16.mxu0 %v353_v0  ;;  %297 = vmatprep.mubr.msk.bf16.mxu0 %vm354_vm0, %v353_v0  ;;  %v39_v2 = vld [vmem:[%s478_s0] sm:$0xff]  ;;  %v40_v3 = vld [vmem:[%s478_s0 + $0x8] sm:$0xff]  ;;  %v43_v4 = vpack.c.bf16 %v42_v1, %v42_v1  ;;  %v105_v7 = vld [vmem:[%s481_s3 + $0x10] sm:$0xff]  ;;  %vm51_vm2 = vcmask 64512   ;;  %vm122_vm3 = vcmask 523264   ;;  %vm233_vm4 = vcmask 31744  }
  0x13   :  { %301 = vmatprep.subr.bf16.mxu1 %v353_v0  ;;  %309 = vmatprep.mubr.msk.bf16.mxu1 %vm354_vm0, %v353_v0  ;;  %v103_v5 = vld [vmem:[%s481_s3] sm:$0xff]  ;;  %v104_v6 = vld [vmem:[%s481_s3 + $0x8] sm:$0xff]  ;;  %v106_v9 = vld [vmem:[%s481_s3 + $0x18] sm:$0xff]  ;;  %v41_v11 = vpack.c.bf16 %v40_v3, %v39_v2 }
  0x14   :  { %v111_v8 = vpack.c.bf16 %v104_v6, %v103_v5  ;;  %v57_v10 = vsel %vm55_vm1, %v43_v4, 0  ;;  %v112_v12 = vpack.c.bf16 %v106_v9, %v105_v7  ;;  %v107_v13 = vld [vmem:[%s481_s3 + $0x20] sm:$0xff]  ;;  %v108_v14 = vld [vmem:[%s481_s3 + $0x28] sm:$0xff]  ;;  %v109_v16 = vld [vmem:[%s481_s3 + $0x30] sm:$0xff] }
  0x15   :  { %296 = vmatpush3.bf16.msra.mxu0 %v57_v10  ;;  %v113_v15 = vpack.c.bf16 %v108_v14, %v107_v13  ;;  %v110_v17 = vld [vmem:[%s481_s3 + $0x38] sm:$0xff]  ;;  %v170_v19 = vld [vmem:[%s483_s5] sm:$0xff]  ;;  %v171_v20 = vld [vmem:[%s483_s5 + $0x8] sm:$0xff] }
  0x16   :  { %302 = vmatpush3.bf16.msra.mxu1 %v111_v8  ;;  %313 = vmatprep.subr.bf16.mxu0 %v353_v0  ;;  %v114_v18 = vpack.c.bf16 %v110_v17, %v109_v16  ;;  %v172_v21 = vld [vmem:[%s483_s5 + $0x10] sm:$0xff]  ;;  %v178_v22 = vpack.c.bf16 %v171_v20, %v170_v19  ;;  %v173_v23 = vld [vmem:[%s483_s5 + $0x18] sm:$0xff]  ;;  %v277_v25 = vld [vmem:[%s480_s2] ss:$0 sm:$0xff] }
  0x17   :  { %303 = vmatprep.subr.bf16.mxu1 %v353_v0  ;;  %v179_v24 = vpack.c.bf16 %v173_v23, %v172_v21  ;;  %v174_v35 = vld [vmem:[%s483_s5 + $0x20] sm:$0xff]  ;;  %v175_v36 = vld [vmem:[%s483_s5 + $0x28] sm:$0xff]  ;;  %v176_v38 = vld [vmem:[%s483_s5 + $0x30] sm:$0xff] }
  0x18   :  { %298 = vmatmul.mubr.msk.bf16.vlgmr.msra.gmra.mrb[0].mxu0 %vm51_vm2, %v41_v11  ;;  %v180_v37 = vpack.c.bf16 %v175_v36, %v174_v35  ;;  %v177_v39 = vld [vmem:[%s483_s5 + $0x38] sm:$0xff]  ;;  %v279_v41 = vld [vmem:[%s482_s4] ss:$0 sm:$0xff] }
  0x19   :  { %321 = vmatprep.mubr.msk.bf16.mxu0 %vm354_vm0, %v353_v0  ;;  %314 = vmatpush3.bf16.msra.mxu0 %v178_v22  ;;  %v181_v40 = vpack.c.bf16 %v177_v39, %v176_v38  ;;  %v281_v51 = vld [vmem:[%s484_s6] ss:$0 sm:$0xff] }
  0x1a   :  { %304 = vmatpush3.bf16.msra.mxu1 %v112_v12  ;;  %315 = vmatprep.subr.bf16.mxu0 %v353_v0 }
  0x1b   :  { %305 = vmatprep.subr.bf16.mxu1 %v353_v0 }
  0x1d   :  { %316 = vmatpush3.bf16.msra.mxu0 %v179_v24 }
  0x1e   :  { %306 = vmatpush3.bf16.msra.mxu1 %v113_v15  ;;  %317 = vmatprep.subr.bf16.mxu0 %v353_v0 }
  0x1f   :  { %307 = vmatprep.subr.bf16.mxu1 %v353_v0 }
  0x21   :  { %318 = vmatpush3.bf16.msra.mxu0 %v180_v37 }
  0x22   :  { %308 = vmatpush3.bf16.msra.mxu1 %v114_v18  ;;  %319 = vmatprep.subr.bf16.mxu0 %v353_v0 }
  0x25   :  { %320 = vmatpush3.bf16.msra.mxu0 %v181_v40 }
  0xeb   :  { %v93_v26 = vpop.f32.mrb[0].mxu0 }
  0xec   :  { %v94_v27 = vadd.f32 %v277_v25, %v93_v26  ;;  %v299_v28 = vpop.f32.mrb[1].mxu0 }
  0xed   :  { %v96_v29 = vpop.f32.mrb[2].mxu0 }
  0xee   :  { %v97_v30 = vadd.f32 %v277_v25, %v96_v29  ;;  %v300_v31 = vpop.f32.mrb[3].mxu0  ;;  %v100_v32 = vmax.f32 %v94_v27, 0.0 }
  0xf0   :  { %v101_v33 = vmax.f32 %v97_v30, 0.0 }
  0xf2   :  { %v102_v34 = vpack.c.bf16 %v101_v33, %v100_v32 }
  0xf4   :  { %310 = vmatmul.mubr.msk.bf16.vlgmr.msra.gmra.mrb[0].mxu1 %vm122_vm3, %v102_v34 }
 0x1c7   :  { %v160_v42 = vpop.f32.mrb[0].mxu1 }
 0x1c8   :  { %v161_v43 = vadd.f32 %v279_v41, %v160_v42  ;;  %v311_v44 = vpop.f32.mrb[1].mxu1 }
 0x1c9   :  { %v163_v45 = vpop.f32.mrb[2].mxu1 }
 0x1ca   :  { %v164_v46 = vadd.f32 %v279_v41, %v163_v45  ;;  %v312_v47 = vpop.f32.mrb[3].mxu1  ;;  %v167_v48 = vmax.f32 %v161_v43, 0.0 }
 0x1cc   :  { %v168_v49 = vmax.f32 %v164_v46, 0.0 }
 0x1ce   :  { %v169_v50 = vpack.c.bf16 %v168_v49, %v167_v48 }
 0x1d0   :  { %322 = vmatmul.mubr.msk.bf16.vlgmr.msra.gmra.mrb[4].mxu0 %vm122_vm3, %v169_v50 }
 0x2a3   :  { %v226_v52 = vpop.f32.mrb[4].mxu0 }
 0x2a4   :  { %v227_v53 = vadd.f32 %v281_v51, %v226_v52  ;;  %v323_v54 = vpop.f32.mrb[5].mxu0 }
 0x2a5   :  { %v229_v55 = vpop.f32.mrb[6].mxu0 }
 0x2a6   :  { %234 = vst.msk [vmem:[#allocation4] sm:$0xff] %vm233_vm4, %v227_v53  ;;  %v324_v56 = vpop.f32.mrb[7].mxu0 }
 0x2ad   :  { %v265_v57 = vld [vmem:[#allocation4] sm:$0xff] }
 0x2ae   :  { %266 = vst [vmem:[%s485_s7] sm:$0xff] %v265_v57 }
 0x2af   :  { %272 = vsyncpa [#allocation3], 1 }

</bundles_post_ra>
